<compile_context>
chip_gen: v7x
topology: tpu7x:2x2x1
jax: 0.10.0
libtpu: 0.0.40
codegen_flags: <defaults>
</compile_context>

<pallas_src>
import jax
import jax.numpy as jnp
from jax.experimental import pallas as pl
from jax.experimental.pallas import tpu as pltpu


def _round_up(x, m):
    return ((x + m - 1) // m) * m


def ffn_kernel(x_ref, w1_ref, b1_ref, w2_ref, b2_ref, o_ref, acc_ref):
    """Row tile (tm, d_model) x one tf-wide slice of the d_ff axis."""
    kf = pl.program_id(1)

    @pl.when(kf == 0)
    def _init():
        acc_ref[...] = jnp.zeros_like(acc_ref)

    # fc1 chunk: (tm, d_model) @ (d_model, tf) -> (tm, tf), f32 accumulation.
    h = jnp.dot(x_ref[...], w1_ref[...], preferred_element_type=jnp.float32)
    # Bias + ReLU in f32 on the VPU.  Per-chunk ReLU is exact: each d_ff slice
    # of relu(x@w1 + b1) only depends on that slice.
    h = jnp.maximum(h + b1_ref[...], 0.0)

    # fc2 partial product accumulated into the f32 scratch.
    acc_ref[...] += jnp.dot(h.astype(w2_ref.dtype), w2_ref[...],
                            preferred_element_type=jnp.float32)

    @pl.when(kf == pl.num_programs(1) - 1)
    def _finalize():
        o_ref[...] = (acc_ref[...] + b2_ref[...]).astype(o_ref.dtype)


def position_wise_ffn(x, w1, b1, w2, b2, *, tm=256, tf=512, mxu_dtype=None):
    """x: [batch, seq, d_model] -> [batch, seq, d_model]."""
    batch, seq, d_model = x.shape
    d_ff = w1.shape[1]
    assert w1.shape == (d_model, d_ff)
    assert w2.shape == (d_ff, d_model)

    out_dtype = x.dtype
    if mxu_dtype is None:
        mxu_dtype = x.dtype  # keep f32 MXU path unless caller asks for bf16

    M = batch * seq

    # Lane-dense padding: last dims to multiples of 128.
    dm_pad = _round_up(d_model, 128)
    tf = max(128, _round_up(min(tf, d_ff), 128))
    dff_pad = _round_up(d_ff, tf)
    # Row tile: multiple of 16 (covers f32 and bf16 sublane packing).
    tm = _round_up(max(tm, 16), 16)
    m_pad = _round_up(M, tm)

    # Zero-padded, (optionally) narrowed operands.  Zero padding keeps the
    # math exact: padded d_ff columns are relu(0)=0 * 0-rows of w2, padded
    # d_model columns / M rows are sliced away below.
    x2 = jnp.zeros((m_pad, dm_pad), mxu_dtype)
    x2 = x2.at[:M, :d_model].set(x.reshape(M, d_model).astype(mxu_dtype))
    w1p = jnp.zeros((dm_pad, dff_pad), mxu_dtype).at[:d_model, :d_ff].set(
        w1.astype(mxu_dtype))
    w2p = jnp.zeros((dff_pad, dm_pad), mxu_dtype).at[:d_ff, :d_model].set(
        w2.astype(mxu_dtype))
    b1p = jnp.zeros((1, dff_pad), jnp.float32).at[0, :d_ff].set(
        b1.astype(jnp.float32))
    b2p = jnp.zeros((1, dm_pad), jnp.float32).at[0, :d_model].set(
        b2.astype(jnp.float32))

    grid = (m_pad // tm, dff_pad // tf)

    itemsize = jnp.dtype(mxu_dtype).itemsize
    cost = pl.CostEstimate(
        flops=2 * m_pad * dm_pad * dff_pad * 2,
        transcendentals=0,
        bytes_accessed=(x2.size + w1p.size + w2p.size) * itemsize
        + (b1p.size + b2p.size) * 4
        + m_pad * dm_pad * jnp.dtype(out_dtype).itemsize,
    )

    out2 = pl.pallas_call(
        ffn_kernel,
        out_shape=jax.ShapeDtypeStruct((m_pad, dm_pad), out_dtype),
        grid_spec=pltpu.PrefetchScalarGridSpec(
            num_scalar_prefetch=0,
            grid=grid,
            in_specs=[
                pl.BlockSpec((tm, dm_pad), lambda i, kf: (i, 0)),    # x tile
                pl.BlockSpec((dm_pad, tf), lambda i, kf: (0, kf)),   # w1 slice
                pl.BlockSpec((1, tf), lambda i, kf: (0, kf)),        # b1 slice
                pl.BlockSpec((tf, dm_pad), lambda i, kf: (kf, 0)),   # w2 slice
                pl.BlockSpec((1, dm_pad), lambda i, kf: (0, 0)),     # b2
            ],
            out_specs=pl.BlockSpec((tm, dm_pad), lambda i, kf: (i, 0)),
            scratch_shapes=[pltpu.VMEM((tm, dm_pad), jnp.float32)],  # f32 acc
        ),
        compiler_params=pltpu.CompilerParams(
            # M tiles independent (megacore-shardable on v7x); d_ff is the
            # reduction axis -> last in grid, "arbitrary".
            dimension_semantics=("parallel", "arbitrary"),
        ),
        cost_estimate=cost,
    )(x2, w1p, b1p, w2p, b2p)

    return out2[:M, :d_model].reshape(batch, seq, d_model)


def init_params(key, d_model, d_ff, dtype=jnp.float32):
    # Deterministic init mimicking nn.Linear's uniform(-1/sqrt(fan_in), ...).
    k1, k2, k3, k4 = jax.random.split(key, 4)
    bound1 = 1.0 / (d_model ** 0.5)
    bound2 = 1.0 / (d_ff ** 0.5)
    # Stored pre-transposed: w1 is [d_model, d_ff] (PyTorch fc1.weight.T).
    w1 = jax.random.uniform(k1, (d_model, d_ff), dtype, -bound1, bound1)
    b1 = jax.random.uniform(k2, (d_ff,), dtype, -bound1, bound1)
    w2 = jax.random.uniform(k3, (d_ff, d_model), dtype, -bound2, bound2)
    b2 = jax.random.uniform(k4, (d_model,), dtype, -bound2, bound2)
    return w1, b1, w2, b2


if __name__ == "__main__":
    key = jax.random.PRNGKey(0)
    batch, seq, d_model, d_ff = 2, 8, 32, 64

    kx, kp = jax.random.split(key)
    x = jax.random.normal(kx, (batch, seq, d_model), jnp.float32)
    w1, b1, w2, b2 = init_params(kp, d_model, d_ff)

    # Reference (same math as the PyTorch forward).
    ref = jnp.maximum(x @ w1 + b1, 0.0) @ w2 + b2

    # f32-operand path: matches reference to tight tolerance.
    out = jax.block_until_ready(position_wise_ffn(x, w1, b1, w2, b2))
    assert out.shape == (batch, seq, d_model)
    assert jnp.allclose(out, ref, atol=1e-5, rtol=1e-5)

    # bf16 MXU-operand path (f32 accumulation) for v6e/v7x throughput.
    out_bf16 = jax.block_until_ready(
        position_wise_ffn(x, w1, b1, w2, b2, mxu_dtype=jnp.bfloat16))
    assert out_bf16.shape == (batch, seq, d_model)
    assert jnp.allclose(out_bf16, ref, atol=5e-2, rtol=5e-2)

    print("KERNEL_OK")
</pallas_src>

<mosaic_0001>
module attributes {stable_mosaic.version = 11 : i64} {
  func.func @ffn_kernel(%arg0: i32, %arg1: i32, %arg2: memref<256x128xf32, #tpu.memory_space<vmem>>, %arg3: memref<128x128xf32, #tpu.memory_space<vmem>>, %arg4: memref<1x128xf32, #tpu.memory_space<vmem>>, %arg5: memref<128x128xf32, #tpu.memory_space<vmem>>, %arg6: memref<1x128xf32, #tpu.memory_space<vmem>>, %arg7: memref<256x128xf32, #tpu.memory_space<vmem>>, %arg8: memref<256x128xf32, #tpu.memory_space<vmem>>) attributes {dimension_semantics = [#tpu.dimension_semantics<parallel>, #tpu.dimension_semantics<arbitrary>], iteration_bounds = array<i64: 1, 1>, scalar_prefetch = 0 : i64, scratch_operands = 1 : i64, tpu.core_type = #tpu.core_type<tc>, window_params = [{transform_indices = @transform_0, window_bounds = array<i64: 256, 128>}, {transform_indices = @transform_1, window_bounds = array<i64: 128, 128>}, {transform_indices = @transform_2, window_bounds = array<i64: 1, 128>}, {transform_indices = @transform_3, window_bounds = array<i64: 128, 128>}, {pipeline_mode = #tpu.pipeline_mode<synchronous>, transform_indices = @transform_4, window_bounds = array<i64: 1, 128>}, {transform_indices = @transform_5, window_bounds = array<i64: 256, 128>}]} {
    %c0_i32 = arith.constant 0 : i32
    %0 = arith.cmpi eq, %arg1, %c0_i32 : i32
    %1 = arith.extui %0 : i1 to i32
    %c0_i32_0 = arith.constant 0 : i32
    %2 = arith.cmpi ne, %1, %c0_i32_0 : i32
    scf.if %2 {
      %cst_16 = arith.constant 0.000000e+00 : f32
      %19 = vector.broadcast %cst_16 : f32 to vector<256x128xf32>
      %c0_17 = arith.constant 0 : index
      %c0_18 = arith.constant 0 : index
      %20 = vector.load %arg8[%c0_17, %c0_18] : memref<256x128xf32, #tpu.memory_space<vmem>>, vector<256x128xf32>
      tpu.vector_store %arg8[%c0_17, %c0_18], %19 {strides = array<i32>} : memref<256x128xf32, #tpu.memory_space<vmem>>, vector<256x128xf32>,
    } else {
    }
    %c0 = arith.constant 0 : index
    %c0_1 = arith.constant 0 : index
    %3 = vector.load %arg2[%c0, %c0_1] : memref<256x128xf32, #tpu.memory_space<vmem>>, vector<256x128xf32>
    %c0_2 = arith.constant 0 : index
    %c0_3 = arith.constant 0 : index
    %4 = vector.load %arg3[%c0_2, %c0_3] : memref<128x128xf32, #tpu.memory_space<vmem>>, vector<128x128xf32>
    %cst = arith.constant dense<0.000000e+00> : vector<256x128xf32>
    %5 = tpu.matmul %3, %4, %cst {dimension_numbers = #tpu.dot_dimension_numbers<[1], [0], [0], [1], [0, 0, 1, 1], [], []>} : vector<256x128xf32>, vector<128x128xf32>, vector<256x128xf32> -> vector<256x128xf32>
    %c0_4 = arith.constant 0 : index
    %c0_5 = arith.constant 0 : index
    %6 = vector.load %arg4[%c0_4, %c0_5] : memref<1x128xf32, #tpu.memory_space<vmem>>, vector<1x128xf32>
    %7 = vector.broadcast %6 : vector<1x128xf32> to vector<256x128xf32>
    %8 = arith.addf %5, %7 : vector<256x128xf32>
    %cst_6 = arith.constant 0.000000e+00 : f32
    %9 = vector.broadcast %cst_6 : f32 to vector<256x128xf32>
    %10 = arith.maximumf %8, %9 : vector<256x128xf32>
    %c0_7 = arith.constant 0 : index
    %c0_8 = arith.constant 0 : index
    %11 = vector.load %arg8[%c0_7, %c0_8] : memref<256x128xf32, #tpu.memory_space<vmem>>, vector<256x128xf32>
    %c0_9 = arith.constant 0 : index
    %c0_10 = arith.constant 0 : index
    %12 = vector.load %arg5[%c0_9, %c0_10] : memref<128x128xf32, #tpu.memory_space<vmem>>, vector<128x128xf32>
    %cst_11 = arith.constant dense<0.000000e+00> : vector<256x128xf32>
    %13 = tpu.matmul %10, %12, %cst_11 {dimension_numbers = #tpu.dot_dimension_numbers<[1], [0], [0], [1], [0, 0, 1, 1], [], []>} : vector<256x128xf32>, vector<128x128xf32>, vector<256x128xf32> -> vector<256x128xf32>
    %14 = arith.addf %11, %13 : vector<256x128xf32>
    %c0_12 = arith.constant 0 : index
    %c0_13 = arith.constant 0 : index
    %15 = vector.load %arg8[%c0_12, %c0_13] : memref<256x128xf32, #tpu.memory_space<vmem>>, vector<256x128xf32>
    tpu.vector_store %arg8[%c0_12, %c0_13], %14 {strides = array<i32>} : memref<256x128xf32, #tpu.memory_space<vmem>>, vector<256x128xf32>,
    %c0_i32_14 = arith.constant 0 : i32
    %16 = arith.cmpi eq, %arg1, %c0_i32_14 : i32
    %17 = arith.extui %16 : i1 to i32
    %c0_i32_15 = arith.constant 0 : i32
    %18 = arith.cmpi ne, %17, %c0_i32_15 : i32
    scf.if %18 {
      %c0_16 = arith.constant 0 : index
      %c0_17 = arith.constant 0 : index
      %19 = vector.load %arg8[%c0_16, %c0_17] : memref<256x128xf32, #tpu.memory_space<vmem>>, vector<256x128xf32>
      %c0_18 = arith.constant 0 : index
      %c0_19 = arith.constant 0 : index
      %20 = vector.load %arg6[%c0_18, %c0_19] : memref<1x128xf32, #tpu.memory_space<vmem>>, vector<1x128xf32>
      %21 = vector.broadcast %20 : vector<1x128xf32> to vector<256x128xf32>
      %22 = arith.addf %19, %21 : vector<256x128xf32>
      %c0_20 = arith.constant 0 : index
      %c0_21 = arith.constant 0 : index
      %23 = vector.load %arg7[%c0_20, %c0_21] : memref<256x128xf32, #tpu.memory_space<vmem>>, vector<256x128xf32>
      tpu.vector_store %arg7[%c0_20, %c0_21], %22 {strides = array<i32>} : memref<256x128xf32, #tpu.memory_space<vmem>>, vector<256x128xf32>,
    } else {
    }
    return
  }
  func.func @transform_0(%arg0: i32, %arg1: i32) -> (i32, i32) {
    %c0_i32 = arith.constant 0 : i32
    %c0_i32_0 = arith.constant 0 : i32
    return %arg0, %c0_i32 : i32, i32
  }
  func.func @transform_1(%arg0: i32, %arg1: i32) -> (i32, i32) {
    %c0_i32 = arith.constant 0 : i32
    %c0_i32_0 = arith.constant 0 : i32
    return %c0_i32, %arg1 : i32, i32
  }
  func.func @transform_2(%arg0: i32, %arg1: i32) -> (i32, i32) {
    %c0_i32 = arith.constant 0 : i32
    %c0_i32_0 = arith.constant 0 : i32
    return %c0_i32, %arg1 : i32, i32
  }
  func.func @transform_3(%arg0: i32, %arg1: i32) -> (i32, i32) {
    %c0_i32 = arith.constant 0 : i32
    %c0_i32_0 = arith.constant 0 : i32
    return %arg1, %c0_i32 : i32, i32
  }
  func.func @transform_4(%arg0: i32, %arg1: i32) -> (i32, i32) {
    %c0_i32 = arith.constant 0 : i32
    %c0_i32_0 = arith.constant 0 : i32
    %c0_i32_1 = arith.constant 0 : i32
    return %c0_i32, %c0_i32_0 : i32, i32
  }
  func.func @transform_5(%arg0: i32, %arg1: i32) -> (i32, i32) {
    %c0_i32 = arith.constant 0 : i32
    %c0_i32_0 = arith.constant 0 : i32
    return %arg0, %c0_i32 : i32, i32
  }
}

</mosaic_0001>

<bundles_post_ra>
// kernel: tpu_custom_call.1
= control target key start
LH: loop header
LB: loop body
LE: loop exit
PB: predicated region body
PF: predicated region fallthrough
CT: control target
= control target key end

     0   :  { %10 = vsyncpa [#allocation4], 0  ;;  %s1470_s0 = inlined_call_operand.hbm [shape: f32[256,128], index: 0, kind: input, shape index: {}]   ;;  %s1471_s1 = inlined_call_operand.hbm [shape: f32[128,128], index: 1, kind: input, shape index: {}]   ;;  %s1472_s2 = inlined_call_operand.vmem [shape: f32[1,128], index: 2, kind: input, shape index: {}]   ;;  %s1473_s3 = inlined_call_operand.hbm [shape: f32[128,128], index: 3, kind: input, shape index: {}]   ;;  %s1474_s4 = inlined_call_operand.vmem [shape: f32[1,128], index: 4, kind: input, shape index: {}]   ;;  %s1475_s5 = inlined_call_operand.hbm [shape: f32[256,128], index: 5, kind: output, shape index: {}]  }
   0x1   :  { %11 = vsyncpa [#allocation7], 0 }
   0x2   :  { %12 = vsyncpa [#allocation5], 0  ;;  %s1293_s18 = smov [#allocation6]   ;;  %s1294_s20 = smov [#allocation3]  }
   0x3   :  { %s30_s19 = sshll.u32 %s1293_s18, 4  ;;  %s18_s21 = sshll.u32 %s1294_s20, 4  ;;  %s31_s19 = int_to_ptr.vmem [resolvable:$true] %s30_s19  ;;  %s1329_s21 = int_to_ptr.vmem [resolvable:$true] %s18_s21 }
   0x4   :  { %s1199_s24 = scalar_lea.hbm %s1471_s1, 2048 }
   0x5   :  { %p1200_p0 = scmp.ne.s32.totalorder %s1471_s1, %s1199_s24  ;;  %p1203_p1 = scmp.lt.u32.totalorder %s1199_s24, %s1471_s1 }
   0x7   :  { %p1205_p2 = pnand %p1203_p1, %p1200_p0 }
   0x9   :  { %1208 = shalt.err (!%p1205_p2)
}
   0xa   :  { %s1209_s29 = scalar_lea.vmem %s31_s19, 2048  ;;  %p1214_p4 = scmp.lt.s32.totalorder %s31_s19, %s31_s19 }
   0xb   :  { %p1210_p3 = scmp.ne.s32.totalorder %s31_s19, %s1209_s29  ;;  %p1215_p5 = scmp.lt.s32.totalorder %s1209_s29, %s1209_s29 }
   0xd   :  { %p1216_p6 = por %p1215_p5, %p1214_p4 }
   0xf   :  { %p1217_p7 = pnand %p1216_p6, %p1210_p3 }
  0x11   :  { %1220 = shalt.err (!%p1217_p7)
}
  0x12   :  { %s1295_s30 = smov 128   ;;  %s1296_s6 = smov 8  }
  0x13   :  { %36 = dma.hbm_to_vmem [thread:$0]  %s1471_s1, 2048, %s31_s19, [#allocation7], %s1295_s30, %s1295_s30, %s1296_s6  }
  0x14   :  { %s1221_s11 = scalar_lea.hbm %s1470_s0, 4096 }
  0x15   :  { %p1222_p8 = scmp.ne.s32.totalorder %s1470_s0, %s1221_s11  ;;  %p1225_p9 = scmp.lt.u32.totalorder %s1221_s11, %s1470_s0 }
  0x17   :  { %p1227_p10 = pnand %p1225_p9, %p1222_p8 }
  0x19   :  { %1230 = shalt.err (!%p1227_p10)
}
  0x1a   :  { %s1231_s16 = scalar_lea.vmem %s1329_s21, 4096  ;;  %p1236_p12 = scmp.lt.s32.totalorder %s1329_s21, %s1329_s21 }
  0x1b   :  { %p1232_p11 = scmp.ne.s32.totalorder %s1329_s21, %s1231_s16  ;;  %p1237_p13 = scmp.lt.s32.totalorder %s1231_s16, %s1231_s16 }
  0x1d   :  { %p1238_p0 = por %p1237_p13, %p1236_p12 }
  0x1f   :  { %p1239_p1 = pnand %p1238_p0, %p1232_p11 }
  0x21   :  { %1242 = shalt.err (!%p1239_p1)
}
  0x22   :  { %24 = dma.hbm_to_vmem [thread:$0]  %s1470_s0, 4096, %s1329_s21, [#allocation4], %s1295_s30, %s1295_s30, %s1296_s6  }
  0x23   :  { %s1297_s18 = smov [#allocation8]   ;;  %s1243_s23 = scalar_lea.hbm %s1473_s3, 2048 }
  0x24   :  { %s44_s19 = sshll.u32 %s1297_s18, 4  ;;  %p1244_p2 = scmp.ne.s32.totalorder %s1473_s3, %s1243_s23  ;;  %s45_s19 = int_to_ptr.vmem [resolvable:$true] %s44_s19 }
  0x25   :  { %p1247_p3 = scmp.lt.u32.totalorder %s1243_s23, %s1473_s3 }
  0x27   :  { %p1249_p4 = pnand %p1247_p3, %p1244_p2 }
  0x29   :  { %1252 = shalt.err (!%p1249_p4)
}
  0x2a   :  { %s1253_s28 = scalar_lea.vmem %s45_s19, 2048  ;;  %p1258_p6 = scmp.lt.s32.totalorder %s45_s19, %s45_s19 }
  0x2b   :  { %p1254_p5 = scmp.ne.s32.totalorder %s45_s19, %s1253_s28  ;;  %p1259_p7 = scmp.lt.s32.totalorder %s1253_s28, %s1253_s28 }
  0x2d   :  { %p1260_p8 = por %p1259_p7, %p1258_p6 }
  0x2f   :  { %p1261_p9 = pnand %p1260_p8, %p1254_p5 }
  0x31   :  { %1264 = shalt.err (!%p1261_p9)
}
  0x32   :  { %50 = dma.hbm_to_vmem [thread:$0]  %s1473_s3, 2048, %s45_s19, [#allocation7], %s1295_s30, %s1295_s30, %s1296_s6  }
  0x33   :  { %1287 = dma.done.wait [#allocation4], 4096  }
  0x34   :  { %1288 = vsyncadd [#allocation4], 4294963200 }
  0x35   :  { %1289 = dma.done.wait [#allocation7], 4096  }
  0x36   :  { %1290 = vsyncadd [#allocation7], 4294963200  ;;  %v130_v0 = vld [vmem:[#allocation6] sm:$0xff]  ;;  %v131_v1 = vld [vmem:[#allocation6 + $0x8] sm:$0xff] }
  0x37   :  { %v132_v2 = vld [vmem:[#allocation6 + $0x10] sm:$0xff]  ;;  %v1129_v3 = vpack.c.bf16 %v131_v1, %v130_v0  ;;  %v133_v4 = vld [vmem:[#allocation6 + $0x18] sm:$0xff]  ;;  %v134_v6 = vld [vmem:[#allocation6 + $0x20] sm:$0xff] }
  0x38   :  { %v1133_v5 = vpack.c.bf16 %v133_v4, %v132_v2  ;;  %v135_v7 = vld [vmem:[#allocation6 + $0x28] sm:$0xff]  ;;  %v98_v9 = vld [vmem:[#allocation3] sm:$0xff]  ;;  %v136_v10 = vld [vmem:[#allocation6 + $0x30] sm:$0xff] }
  0x39   :  { %1130 = vmatprep.subr.bf16.mxu0 %v1129_v3  ;;  %v1137_v8 = vpack.c.bf16 %v135_v7, %v134_v6  ;;  %v137_v11 = vld [vmem:[#allocation6 + $0x38] sm:$0xff]  ;;  %1001 = vmatprep.mubr.f32.mxu0 %v98_v9  ;;  %v138_v13 = vld [vmem:[#allocation6 + $0x40] sm:$0xff]  ;;  %v139_v14 = vld [vmem:[#allocation6 + $0x48] sm:$0xff] }
  0x3a   :  { %1132 = vmatpush3.bf16.msra.mxu0 %v1129_v3  ;;  %v1141_v12 = vpack.c.bf16 %v137_v11, %v136_v10  ;;  %v1145_v15 = vpack.c.bf16 %v139_v14, %v138_v13  ;;  %v140_v16 = vld [vmem:[#allocation6 + $0x50] sm:$0xff]  ;;  %v141_v17 = vld [vmem:[#allocation6 + $0x58] sm:$0xff]  ;;  %v442_v18 = vld [vmem:[#allocation8] sm:$0xff] }
  0x3b   :  { %1134 = vmatprep.subr.bf16.mxu0 %v1133_v5  ;;  %v443_v19 = vld [vmem:[#allocation8 + $0x8] sm:$0xff]  ;;  %v444_v20 = vld [vmem:[#allocation8 + $0x10] sm:$0xff]  ;;  %v1149_v21 = vpack.c.bf16 %v141_v17, %v140_v16  ;;  %v142_v22 = vld [vmem:[#allocation6 + $0x60] sm:$0xff] }
  0x3c   :  { %v1161_v23 = vpack.c.bf16 %v443_v19, %v442_v18  ;;  %v445_v24 = vld [vmem:[#allocation8 + $0x18] sm:$0xff]  ;;  %v143_v25 = vld [vmem:[#allocation6 + $0x68] sm:$0xff]  ;;  %v446_v27 = vld [vmem:[#allocation8 + $0x20] sm:$0xff] }
  0x3d   :  { %v1165_v26 = vpack.c.bf16 %v445_v24, %v444_v20  ;;  %v447_v28 = vld [vmem:[#allocation8 + $0x28] sm:$0xff]  ;;  %v1153_v29 = vpack.c.bf16 %v143_v25, %v142_v22  ;;  %v144_v30 = vld [vmem:[#allocation6 + $0x70] sm:$0xff]  ;;  %v145_v32 = vld [vmem:[#allocation6 + $0x78] sm:$0xff] }
  0x3e   :  { %1136 = vmatpush3.bf16.msra.mxu0 %v1133_v5  ;;  %1162 = vmatprep.subr.bf16.mxu1 %v1161_v23  ;;  %v1169_v31 = vpack.c.bf16 %v447_v28, %v446_v27  ;;  %v448_v33 = vld [vmem:[#allocation8 + $0x30] sm:$0xff]  ;;  %v449_v34 = vld [vmem:[#allocation8 + $0x38] sm:$0xff]  ;;  %v1157_v35 = vpack.c.bf16 %v145_v32, %v144_v30  ;;  %v450_v37 = vld [vmem:[#allocation8 + $0x40] sm:$0xff] }
  0x3f   :  { %1138 = vmatprep.subr.bf16.mxu0 %v1137_v8  ;;  %1164 = vmatpush3.bf16.msra.mxu1 %v1161_v23  ;;  %v1173_v36 = vpack.c.bf16 %v449_v34, %v448_v33  ;;  %v451_v38 = vld [vmem:[#allocation8 + $0x48] sm:$0xff]  ;;  %v452_v40 = vld [vmem:[#allocation8 + $0x50] sm:$0xff]  ;;  %v453_v41 = vld [vmem:[#allocation8 + $0x58] sm:$0xff] }
  0x40   :  { %1166 = vmatprep.subr.bf16.mxu1 %v1165_v26  ;;  %v1177_v39 = vpack.c.bf16 %v451_v38, %v450_v37  ;;  %v99_v42 = vld [vmem:[#allocation3 + $0x8] sm:$0xff]  ;;  %v100_v43 = vld [vmem:[#allocation3 + $0x10] sm:$0xff]  ;;  %v1181_v44 = vpack.c.bf16 %v453_v41, %v452_v40  ;;  %v454_v45 = vld [vmem:[#allocation8 + $0x60] sm:$0xff] }
  0x41   :  { %v455_v46 = vld [vmem:[#allocation8 + $0x68] sm:$0xff]  ;;  %v101_v47 = vld [vmem:[#allocation3 + $0x18] sm:$0xff]  ;;  %v102_v48 = vld [vmem:[#allocation3 + $0x20] sm:$0xff] }
  0x42   :  { %1140 = vmatpush3.bf16.msra.mxu0 %v1137_v8  ;;  %v1185_v49 = vpack.c.bf16 %v455_v46, %v454_v45  ;;  %v103_v50 = vld [vmem:[#allocation3 + $0x28] sm:$0xff]  ;;  %v104_v51 = vld [vmem:[#allocation3 + $0x30] sm:$0xff]  ;;  %v105_v52 = vld [vmem:[#allocation3 + $0x38] sm:$0xff] }
  0x43   :  { %1142 = vmatprep.subr.bf16.mxu0 %v1141_v12  ;;  %1168 = vmatpush3.bf16.msra.mxu1 %v1165_v26  ;;  %v106_v53 = vld [vmem:[#allocation3 + $0x40] sm:$0xff]  ;;  %v107_v54 = vld [vmem:[#allocation3 + $0x48] sm:$0xff]  ;;  %v108_v55 = vld [vmem:[#allocation3 + $0x50] sm:$0xff] }
  0x44   :  { %1170 = vmatprep.subr.bf16.mxu1 %v1169_v31  ;;  %v109_v56 = vld [vmem:[#allocation3 + $0x58] sm:$0xff]  ;;  %v110_v57 = vld [vmem:[#allocation3 + $0x60] sm:$0xff]  ;;  %v111_v58 = vld [vmem:[#allocation3 + $0x68] sm:$0xff] }
  0x45   :  { %v112_v59 = vld [vmem:[#allocation3 + $0x70] sm:$0xff]  ;;  %v113_v60 = vld [vmem:[#allocation3 + $0x78] sm:$0xff]  ;;  %v114_v61 = vld [vmem:[#allocation3 + $0x80] sm:$0xff] }
  0x46   :  { %1144 = vmatpush3.bf16.msra.mxu0 %v1141_v12  ;;  %v115_v62 = vld [vmem:[#allocation3 + $0x88] sm:$0xff]  ;;  %v116_v63 = vld [vmem:[#allocation3 + $0x90] sm:$0xff]  ;;  %v117_v0 = vld [vmem:[#allocation3 + $0x98] sm:$0xff] }
  0x47   :  { %1146 = vmatprep.subr.bf16.mxu0 %v1145_v15  ;;  %1172 = vmatpush3.bf16.msra.mxu1 %v1169_v31  ;;  %v118_v1 = vld [vmem:[#allocation3 + $0xa0] sm:$0xff]  ;;  %v119_v2 = vld [vmem:[#allocation3 + $0xa8] sm:$0xff]  ;;  %v120_v3 = vld [vmem:[#allocation3 + $0xb0] sm:$0xff] }
  0x48   :  { %1174 = vmatprep.subr.bf16.mxu1 %v1173_v36  ;;  %v121_v4 = vld [vmem:[#allocation3 + $0xb8] sm:$0xff]  ;;  %v122_v5 = vld [vmem:[#allocation3 + $0xc0] sm:$0xff]  ;;  %v123_v6 = vld [vmem:[#allocation3 + $0xc8] sm:$0xff] }
  0x49   :  { %v124_v7 = vld [vmem:[#allocation3 + $0xd0] sm:$0xff]  ;;  %v125_v8 = vld [vmem:[#allocation3 + $0xd8] sm:$0xff]  ;;  %v126_v9 = vld [vmem:[#allocation3 + $0xe0] sm:$0xff] }
  0x4a   :  { %1148 = vmatpush3.bf16.msra.mxu0 %v1145_v15  ;;  %v127_v10 = vld [vmem:[#allocation3 + $0xe8] sm:$0xff]  ;;  %v128_v11 = vld [vmem:[#allocation3 + $0xf0] sm:$0xff]  ;;  %v129_v12 = vld [vmem:[#allocation3 + $0xf8] sm:$0xff] }
  0x4b   :  { %1150 = vmatprep.subr.bf16.mxu0 %v1149_v21  ;;  %1176 = vmatpush3.bf16.msra.mxu1 %v1173_v36  ;;  %v456_v13 = vld [vmem:[#allocation8 + $0x70] sm:$0xff]  ;;  %v457_v14 = vld [vmem:[#allocation8 + $0x78] sm:$0xff]  ;;  %v1384_v16 = vld [vmem:[%s1472_s2] ss:$0 sm:$0xff] }
  0x4c   :  { %1178 = vmatprep.subr.bf16.mxu1 %v1177_v39  ;;  %v1189_v15 = vpack.c.bf16 %v457_v14, %v456_v13 }
  0x4e   :  { %1152 = vmatpush3.bf16.msra.mxu0 %v1149_v21 }
  0x4f   :  { %1154 = vmatprep.subr.bf16.mxu0 %v1153_v29  ;;  %1180 = vmatpush3.bf16.msra.mxu1 %v1177_v39 }
  0x50   :  { %1182 = vmatprep.subr.bf16.mxu1 %v1181_v44 }
  0x52   :  { %1156 = vmatpush3.bf16.msra.mxu0 %v1153_v29 }
  0x53   :  { %1158 = vmatprep.subr.bf16.mxu0 %v1157_v35  ;;  %1184 = vmatpush3.bf16.msra.mxu1 %v1181_v44 }
  0x54   :  { %1186 = vmatprep.subr.bf16.mxu1 %v1185_v49 }
  0x56   :  { %1160 = vmatpush3.bf16.msra.mxu0 %v1157_v35 }
  0x57   :  { %1188 = vmatpush3.bf16.msra.mxu1 %v1185_v49 }
  0x58   :  { %1190 = vmatprep.subr.bf16.mxu1 %v1189_v15 }
  0x59   :  { %1002 = vmatmul.mubr.f32.vlgmr.msra.gmra.mrb[0].mxu0 %v99_v42 }
  0x5a   :  { %1004 = vmatprep.mubr.f32.mxu0 %v100_v43 }
  0x5b   :  { %1192 = vmatpush3.bf16.msra.mxu1 %v1189_v15 }
  0x5d   :  { %1005 = vmatmul.mubr.f32.gmra.mrb[2].mxu0 %v101_v47 }
  0x5e   :  { %1007 = vmatprep.mubr.f32.mxu0 %v102_v48 }
  0x61   :  { %1008 = vmatmul.mubr.f32.gmra.mrb[4].mxu0 %v103_v50 }
  0x62   :  { %1010 = vmatprep.mubr.f32.mxu0 %v104_v51 }
  0x65   :  { %1011 = vmatmul.mubr.f32.gmra.mrb[6].mxu0 %v105_v52 }
  0x66   :  { %1013 = vmatprep.mubr.f32.mxu0 %v106_v53 }
  0x69   :  { %1014 = vmatmul.mubr.f32.gmra.mrb[8].mxu0 %v107_v54 }
  0x6a   :  { %1016 = vmatprep.mubr.f32.mxu0 %v108_v55 }
  0x6d   :  { %1017 = vmatmul.mubr.f32.gmra.mrb[10].mxu0 %v109_v56 }
  0x6e   :  { %1019 = vmatprep.mubr.f32.mxu0 %v110_v57 }
  0x71   :  { %1020 = vmatmul.mubr.f32.gmra.mrb[12].mxu0 %v111_v58 }
  0x72   :  { %1022 = vmatprep.mubr.f32.mxu0 %v112_v59 }
  0x75   :  { %1023 = vmatmul.mubr.f32.gmra.mrb[14].mxu0 %v113_v60 }
  0x76   :  { %1025 = vmatprep.mubr.f32.mxu0 %v114_v61 }
  0x79   :  { %1026 = vmatmul.mubr.f32.gmra.mrb[16].mxu0 %v115_v62 }
  0x7a   :  { %1028 = vmatprep.mubr.f32.mxu0 %v116_v63 }
  0x7d   :  { %1029 = vmatmul.mubr.f32.gmra.mrb[18].mxu0 %v117_v0 }
  0x7e   :  { %1031 = vmatprep.mubr.f32.mxu0 %v118_v1 }
  0x81   :  { %1032 = vmatmul.mubr.f32.gmra.mrb[20].mxu0 %v119_v2 }
  0x82   :  { %1034 = vmatprep.mubr.f32.mxu0 %v120_v3 }
  0x85   :  { %1035 = vmatmul.mubr.f32.gmra.mrb[22].mxu0 %v121_v4 }
  0x86   :  { %1037 = vmatprep.mubr.f32.mxu0 %v122_v5 }
  0x89   :  { %1038 = vmatmul.mubr.f32.gmra.mrb[24].mxu0 %v123_v6 }
  0x8a   :  { %1040 = vmatprep.mubr.f32.mxu0 %v124_v7 }
  0x8d   :  { %1041 = vmatmul.mubr.f32.gmra.mrb[26].mxu0 %v125_v8 }
  0x8e   :  { %1043 = vmatprep.mubr.f32.mxu0 %v126_v9 }
  0x91   :  { %1044 = vmatmul.mubr.f32.gmra.mrb[28].mxu0 %v127_v10 }
  0x92   :  { %1046 = vmatprep.mubr.f32.mxu0 %v128_v11 }
  0x95   :  { %1047 = vmatmul.mubr.f32.gmra.mrb[30].mxu0 %v129_v12 }
 0x12c   :  { %v1003_v17 = vpop.f32.mrb[0].mxu0 }
 0x12d   :  { %v225_v18 = vadd.f32 %v1003_v17, %v1384_v16  ;;  %v219_v19 = vpop.f32.mrb[1].mxu0 }
 0x12e   :  { %v220_v20 = vadd.f32 %v1384_v16, %v219_v19 }
 0x12f   :  { %v379_v23 = vmax.f32 %v225_v18, 0.0 }
 0x130   :  { %v1006_v21 = vpop.f32.mrb[2].mxu0  ;;  %v378_v22 = vmax.f32 %v220_v20, 0.0 }
 0x131   :  { %v235_v24 = vadd.f32 %v1006_v21, %v1384_v16  ;;  %v229_v25 = vpop.f32.mrb[3].mxu0 }
 0x132   :  { %v230_v26 = vadd.f32 %v1384_v16, %v229_v25  ;;  %1081 = vmatprep.mubr.f32.mxu1 %v378_v22 }
 0x133   :  { %1082 = vmatmul.mubr.f32.vlgmr.msra.gmra.mrb[0].mxu1 %v379_v23  ;;  %v381_v29 = vmax.f32 %v235_v24, 0.0 }
 0x134   :  { %v380_v27 = vmax.f32 %v230_v26, 0.0  ;;  %v1009_v28 = vpop.f32.mrb[4].mxu0 }
 0x135   :  { %v245_v30 = vadd.f32 %v1009_v28, %v1384_v16  ;;  %v239_v31 = vpop.f32.mrb[5].mxu0 }
 0x136   :  { %v240_v32 = vadd.f32 %v1384_v16, %v239_v31  ;;  %1084 = vmatprep.mubr.f32.mxu1 %v380_v27 }
 0x137   :  { %1085 = vmatmul.mubr.f32.gmra.mrb[2].mxu1 %v381_v29  ;;  %v383_v35 = vmax.f32 %v245_v30, 0.0 }
 0x138   :  { %v382_v33 = vmax.f32 %v240_v32, 0.0  ;;  %v1012_v34 = vpop.f32.mrb[6].mxu0 }
 0x139   :  { %v255_v36 = vadd.f32 %v1012_v34, %v1384_v16  ;;  %v249_v37 = vpop.f32.mrb[7].mxu0 }
 0x13a   :  { %v250_v38 = vadd.f32 %v1384_v16, %v249_v37  ;;  %1087 = vmatprep.mubr.f32.mxu1 %v382_v33 }
 0x13b   :  { %1088 = vmatmul.mubr.f32.gmra.mrb[4].mxu1 %v383_v35  ;;  %v385_v41 = vmax.f32 %v255_v36, 0.0 }
 0x13c   :  { %v384_v39 = vmax.f32 %v250_v38, 0.0  ;;  %v1015_v40 = vpop.f32.mrb[8].mxu0 }
 0x13d   :  { %v265_v42 = vadd.f32 %v1015_v40, %v1384_v16  ;;  %v259_v43 = vpop.f32.mrb[9].mxu0 }
 0x13e   :  { %v260_v44 = vadd.f32 %v1384_v16, %v259_v43  ;;  %1090 = vmatprep.mubr.f32.mxu1 %v384_v39 }
 0x13f   :  { %1091 = vmatmul.mubr.f32.gmra.mrb[6].mxu1 %v385_v41  ;;  %v387_v47 = vmax.f32 %v265_v42, 0.0 }
 0x140   :  { %v386_v45 = vmax.f32 %v260_v44, 0.0  ;;  %v1018_v46 = vpop.f32.mrb[10].mxu0 }
 0x141   :  { %v275_v48 = vadd.f32 %v1018_v46, %v1384_v16  ;;  %v269_v49 = vpop.f32.mrb[11].mxu0 }
 0x142   :  { %v270_v50 = vadd.f32 %v1384_v16, %v269_v49  ;;  %1093 = vmatprep.mubr.f32.mxu1 %v386_v45 }
 0x143   :  { %1094 = vmatmul.mubr.f32.gmra.mrb[8].mxu1 %v387_v47  ;;  %v389_v53 = vmax.f32 %v275_v48, 0.0 }
 0x144   :  { %v388_v51 = vmax.f32 %v270_v50, 0.0  ;;  %v1021_v52 = vpop.f32.mrb[12].mxu0  ;;  %v1421_v50 = vld [vmem:[%s1474_s4] ss:$0 sm:$0xff]  ;;  %s1298_s4 = smov [#allocation9]  }
 0x145   :  { %v285_v54 = vadd.f32 %v1021_v52, %v1384_v16  ;;  %v279_v55 = vpop.f32.mrb[13].mxu0  ;;  %s858_s8 = sshll.u32 %s1298_s4, 4  ;;  %s859_s8 = int_to_ptr.vmem [resolvable:$true] %s858_s8 }
 0x146   :  { %v280_v56 = vadd.f32 %v1384_v16, %v279_v55  ;;  %1096 = vmatprep.mubr.f32.mxu1 %v388_v51  ;;  %s1265_s9 = scalar_lea.vmem %s859_s8, 4096  ;;  %p1270_p11 = scmp.lt.s32.totalorder %s859_s8, %s859_s8 }
 0x147   :  { %1097 = vmatmul.mubr.f32.gmra.mrb[10].mxu1 %v389_v53  ;;  %v391_v59 = vmax.f32 %v285_v54, 0.0  ;;  %p1266_p10 = scmp.ne.s32.totalorder %s859_s8, %s1265_s9  ;;  %p1271_p12 = scmp.lt.s32.totalorder %s1265_s9, %s1265_s9 }
 0x148   :  { %v390_v57 = vmax.f32 %v280_v56, 0.0  ;;  %v1024_v58 = vpop.f32.mrb[14].mxu0 }
 0x149   :  { %v295_v60 = vadd.f32 %v1024_v58, %v1384_v16  ;;  %v289_v61 = vpop.f32.mrb[15].mxu0  ;;  %p1272_p13 = por %p1271_p12, %p1270_p11 }
 0x14a   :  { %v290_v62 = vadd.f32 %v1384_v16, %v289_v61  ;;  %1099 = vmatprep.mubr.f32.mxu1 %v390_v57 }
 0x14b   :  { %1100 = vmatmul.mubr.f32.gmra.mrb[12].mxu1 %v391_v59  ;;  %v393_v1 = vmax.f32 %v295_v60, 0.0  ;;  %p1273_p0 = pnand %p1272_p13, %p1266_p10 }
 0x14c   :  { %v392_v63 = vmax.f32 %v290_v62, 0.0  ;;  %v1027_v0 = vpop.f32.mrb[16].mxu0 }
 0x14d   :  { %v305_v2 = vadd.f32 %v1027_v0, %v1384_v16  ;;  %v299_v3 = vpop.f32.mrb[17].mxu0 }
 0x14e   :  { %v300_v4 = vadd.f32 %v1384_v16, %v299_v3  ;;  %1102 = vmatprep.mubr.f32.mxu1 %v392_v63 }
 0x14f   :  { %1103 = vmatmul.mubr.f32.gmra.mrb[14].mxu1 %v393_v1  ;;  %v395_v7 = vmax.f32 %v305_v2, 0.0 }
 0x150   :  { %v394_v5 = vmax.f32 %v300_v4, 0.0  ;;  %v1030_v6 = vpop.f32.mrb[18].mxu0 }
 0x151   :  { %v315_v8 = vadd.f32 %v1030_v6, %v1384_v16  ;;  %v309_v9 = vpop.f32.mrb[19].mxu0 }
 0x152   :  { %v310_v10 = vadd.f32 %v1384_v16, %v309_v9  ;;  %1105 = vmatprep.mubr.f32.mxu1 %v394_v5 }
 0x153   :  { %1106 = vmatmul.mubr.f32.gmra.mrb[16].mxu1 %v395_v7  ;;  %v397_v13 = vmax.f32 %v315_v8, 0.0 }
 0x154   :  { %v396_v11 = vmax.f32 %v310_v10, 0.0  ;;  %v1033_v12 = vpop.f32.mrb[20].mxu0 }
 0x155   :  { %v325_v14 = vadd.f32 %v1033_v12, %v1384_v16  ;;  %v319_v15 = vpop.f32.mrb[21].mxu0 }
 0x156   :  { %v320_v17 = vadd.f32 %v1384_v16, %v319_v15  ;;  %1108 = vmatprep.mubr.f32.mxu1 %v396_v11 }
 0x157   :  { %1109 = vmatmul.mubr.f32.gmra.mrb[18].mxu1 %v397_v13  ;;  %v399_v20 = vmax.f32 %v325_v14, 0.0 }
 0x158   :  { %v398_v18 = vmax.f32 %v320_v17, 0.0  ;;  %v1036_v19 = vpop.f32.mrb[22].mxu0 }
 0x159   :  { %v335_v21 = vadd.f32 %v1036_v19, %v1384_v16  ;;  %v329_v22 = vpop.f32.mrb[23].mxu0 }
 0x15a   :  { %v330_v23 = vadd.f32 %v1384_v16, %v329_v22  ;;  %1111 = vmatprep.mubr.f32.mxu1 %v398_v18 }
 0x15b   :  { %1112 = vmatmul.mubr.f32.gmra.mrb[20].mxu1 %v399_v20  ;;  %v401_v26 = vmax.f32 %v335_v21, 0.0 }
 0x15c   :  { %v400_v24 = vmax.f32 %v330_v23, 0.0  ;;  %v1039_v25 = vpop.f32.mrb[24].mxu0 }
 0x15d   :  { %v345_v27 = vadd.f32 %v1039_v25, %v1384_v16  ;;  %v339_v28 = vpop.f32.mrb[25].mxu0 }
 0x15e   :  { %v340_v29 = vadd.f32 %v1384_v16, %v339_v28  ;;  %1114 = vmatprep.mubr.f32.mxu1 %v400_v24 }
 0x15f   :  { %1115 = vmatmul.mubr.f32.gmra.mrb[22].mxu1 %v401_v26  ;;  %v403_v32 = vmax.f32 %v345_v27, 0.0 }
 0x160   :  { %v402_v30 = vmax.f32 %v340_v29, 0.0  ;;  %v1042_v31 = vpop.f32.mrb[26].mxu0 }
 0x161   :  { %v355_v33 = vadd.f32 %v1042_v31, %v1384_v16  ;;  %v349_v34 = vpop.f32.mrb[27].mxu0 }
 0x162   :  { %v350_v35 = vadd.f32 %v1384_v16, %v349_v34  ;;  %1117 = vmatprep.mubr.f32.mxu1 %v402_v30 }
 0x163   :  { %1118 = vmatmul.mubr.f32.gmra.mrb[24].mxu1 %v403_v32  ;;  %v405_v38 = vmax.f32 %v355_v33, 0.0 }
 0x164   :  { %v404_v36 = vmax.f32 %v350_v35, 0.0  ;;  %v1045_v37 = vpop.f32.mrb[28].mxu0 }
 0x165   :  { %v365_v39 = vadd.f32 %v1045_v37, %v1384_v16  ;;  %v359_v40 = vpop.f32.mrb[29].mxu0 }
 0x166   :  { %v360_v41 = vadd.f32 %v1384_v16, %v359_v40  ;;  %1120 = vmatprep.mubr.f32.mxu1 %v404_v36 }
 0x167   :  { %1121 = vmatmul.mubr.f32.gmra.mrb[26].mxu1 %v405_v38  ;;  %v407_v44 = vmax.f32 %v365_v39, 0.0 }
 0x168   :  { %v406_v42 = vmax.f32 %v360_v41, 0.0  ;;  %v1048_v43 = vpop.f32.mrb[30].mxu0 }
 0x169   :  { %v375_v45 = vadd.f32 %v1048_v43, %v1384_v16  ;;  %v369_v46 = vpop.f32.mrb[31].mxu0 }
 0x16a   :  { %v370_v47 = vadd.f32 %v1384_v16, %v369_v46  ;;  %1123 = vmatprep.mubr.f32.mxu1 %v406_v42 }
 0x16b   :  { %1124 = vmatmul.mubr.f32.gmra.mrb[28].mxu1 %v407_v44  ;;  %v409_v49 = vmax.f32 %v375_v45, 0.0 }
 0x16c   :  { %v408_v48 = vmax.f32 %v370_v47, 0.0 }
 0x16e   :  { %1126 = vmatprep.mubr.f32.mxu1 %v408_v48 }
 0x16f   :  { %1127 = vmatmul.mubr.f32.gmra.mrb[30].mxu1 %v409_v49 }
 0x206   :  { %v1083_v51 = vpop.f32.mrb[0].mxu1 }
 0x207   :  { %v790_v52 = vadd.f32 %v1083_v51, %v1421_v50  ;;  %v524_v53 = vpop.f32.mrb[1].mxu1 }
 0x208   :  { %v789_v54 = vadd.f32 %v1421_v50, %v524_v53 }
 0x209   :  { %822 = vst [vmem:[#allocation9 + $0x8] sm:$0xff] %v790_v52 }
 0x20a   :  { %821 = vst [vmem:[#allocation9] sm:$0xff] %v789_v54  ;;  %v1086_v16 = vpop.f32.mrb[2].mxu1 }
 0x20b   :  { %v792_v55 = vadd.f32 %v1086_v16, %v1421_v50  ;;  %v534_v56 = vpop.f32.mrb[3].mxu1 }
 0x20c   :  { %v791_v57 = vadd.f32 %v1421_v50, %v534_v56 }
 0x20d   :  { %824 = vst [vmem:[#allocation9 + $0x18] sm:$0xff] %v792_v55 }
 0x20e   :  { %823 = vst [vmem:[#allocation9 + $0x10] sm:$0xff] %v791_v57  ;;  %v1089_v58 = vpop.f32.mrb[4].mxu1 }
 0x20f   :  { %v794_v59 = vadd.f32 %v1089_v58, %v1421_v50  ;;  %v544_v60 = vpop.f32.mrb[5].mxu1 }
 0x210   :  { %v793_v61 = vadd.f32 %v1421_v50, %v544_v60 }
 0x211   :  { %826 = vst [vmem:[#allocation9 + $0x28] sm:$0xff] %v794_v59 }
 0x212   :  { %825 = vst [vmem:[#allocation9 + $0x20] sm:$0xff] %v793_v61  ;;  %v1092_v62 = vpop.f32.mrb[6].mxu1 }
 0x213   :  { %v796_v63 = vadd.f32 %v1092_v62, %v1421_v50  ;;  %v554_v0 = vpop.f32.mrb[7].mxu1 }
 0x214   :  { %v795_v1 = vadd.f32 %v1421_v50, %v554_v0 }
 0x215   :  { %828 = vst [vmem:[#allocation9 + $0x38] sm:$0xff] %v796_v63 }
 0x216   :  { %827 = vst [vmem:[#allocation9 + $0x30] sm:$0xff] %v795_v1  ;;  %v1095_v2 = vpop.f32.mrb[8].mxu1 }
 0x217   :  { %v798_v3 = vadd.f32 %v1095_v2, %v1421_v50  ;;  %v564_v4 = vpop.f32.mrb[9].mxu1 }
 0x218   :  { %v797_v5 = vadd.f32 %v1421_v50, %v564_v4 }
 0x219   :  { %830 = vst [vmem:[#allocation9 + $0x48] sm:$0xff] %v798_v3 }
 0x21a   :  { %829 = vst [vmem:[#allocation9 + $0x40] sm:$0xff] %v797_v5  ;;  %v1098_v6 = vpop.f32.mrb[10].mxu1 }
 0x21b   :  { %v800_v7 = vadd.f32 %v1098_v6, %v1421_v50  ;;  %v574_v8 = vpop.f32.mrb[11].mxu1 }
 0x21c   :  { %v799_v9 = vadd.f32 %v1421_v50, %v574_v8 }
 0x21d   :  { %832 = vst [vmem:[#allocation9 + $0x58] sm:$0xff] %v800_v7 }
 0x21e   :  { %831 = vst [vmem:[#allocation9 + $0x50] sm:$0xff] %v799_v9  ;;  %v1101_v10 = vpop.f32.mrb[12].mxu1 }
 0x21f   :  { %v802_v11 = vadd.f32 %v1101_v10, %v1421_v50  ;;  %v584_v12 = vpop.f32.mrb[13].mxu1 }
 0x220   :  { %v801_v13 = vadd.f32 %v1421_v50, %v584_v12 }
 0x221   :  { %834 = vst [vmem:[#allocation9 + $0x68] sm:$0xff] %v802_v11 }
 0x222   :  { %833 = vst [vmem:[#allocation9 + $0x60] sm:$0xff] %v801_v13  ;;  %v1104_v14 = vpop.f32.mrb[14].mxu1 }
 0x223   :  { %v804_v15 = vadd.f32 %v1104_v14, %v1421_v50  ;;  %v594_v17 = vpop.f32.mrb[15].mxu1 }
 0x224   :  { %v803_v18 = vadd.f32 %v1421_v50, %v594_v17 }
 0x225   :  { %836 = vst [vmem:[#allocation9 + $0x78] sm:$0xff] %v804_v15 }
 0x226   :  { %835 = vst [vmem:[#allocation9 + $0x70] sm:$0xff] %v803_v18  ;;  %v1107_v19 = vpop.f32.mrb[16].mxu1 }
 0x227   :  { %v806_v20 = vadd.f32 %v1107_v19, %v1421_v50  ;;  %v604_v21 = vpop.f32.mrb[17].mxu1 }
 0x228   :  { %v805_v22 = vadd.f32 %v1421_v50, %v604_v21 }
 0x229   :  { %838 = vst [vmem:[#allocation9 + $0x88] sm:$0xff] %v806_v20 }
 0x22a   :  { %837 = vst [vmem:[#allocation9 + $0x80] sm:$0xff] %v805_v22  ;;  %v1110_v23 = vpop.f32.mrb[18].mxu1 }
 0x22b   :  { %v808_v24 = vadd.f32 %v1110_v23, %v1421_v50  ;;  %v614_v25 = vpop.f32.mrb[19].mxu1 }
 0x22c   :  { %v807_v26 = vadd.f32 %v1421_v50, %v614_v25 }
 0x22d   :  { %840 = vst [vmem:[#allocation9 + $0x98] sm:$0xff] %v808_v24 }
 0x22e   :  { %839 = vst [vmem:[#allocation9 + $0x90] sm:$0xff] %v807_v26  ;;  %v1113_v27 = vpop.f32.mrb[20].mxu1 }
 0x22f   :  { %v810_v28 = vadd.f32 %v1113_v27, %v1421_v50  ;;  %v624_v29 = vpop.f32.mrb[21].mxu1 }
 0x230   :  { %v809_v30 = vadd.f32 %v1421_v50, %v624_v29 }
 0x231   :  { %842 = vst [vmem:[#allocation9 + $0xa8] sm:$0xff] %v810_v28 }
 0x232   :  { %841 = vst [vmem:[#allocation9 + $0xa0] sm:$0xff] %v809_v30  ;;  %v1116_v31 = vpop.f32.mrb[22].mxu1 }
 0x233   :  { %v812_v32 = vadd.f32 %v1116_v31, %v1421_v50  ;;  %v634_v33 = vpop.f32.mrb[23].mxu1 }
 0x234   :  { %v811_v34 = vadd.f32 %v1421_v50, %v634_v33 }
 0x235   :  { %844 = vst [vmem:[#allocation9 + $0xb8] sm:$0xff] %v812_v32 }
 0x236   :  { %843 = vst [vmem:[#allocation9 + $0xb0] sm:$0xff] %v811_v34  ;;  %v1119_v35 = vpop.f32.mrb[24].mxu1 }
 0x237   :  { %v814_v36 = vadd.f32 %v1119_v35, %v1421_v50  ;;  %v644_v37 = vpop.f32.mrb[25].mxu1 }
 0x238   :  { %v813_v38 = vadd.f32 %v1421_v50, %v644_v37 }
 0x239   :  { %846 = vst [vmem:[#allocation9 + $0xc8] sm:$0xff] %v814_v36 }
 0x23a   :  { %845 = vst [vmem:[#allocation9 + $0xc0] sm:$0xff] %v813_v38  ;;  %v1122_v39 = vpop.f32.mrb[26].mxu1 }
 0x23b   :  { %v816_v40 = vadd.f32 %v1122_v39, %v1421_v50  ;;  %v654_v41 = vpop.f32.mrb[27].mxu1 }
 0x23c   :  { %v815_v42 = vadd.f32 %v1421_v50, %v654_v41 }
 0x23d   :  { %848 = vst [vmem:[#allocation9 + $0xd8] sm:$0xff] %v816_v40 }
 0x23e   :  { %847 = vst [vmem:[#allocation9 + $0xd0] sm:$0xff] %v815_v42  ;;  %v1125_v43 = vpop.f32.mrb[28].mxu1 }
 0x23f   :  { %v818_v44 = vadd.f32 %v1125_v43, %v1421_v50  ;;  %v664_v45 = vpop.f32.mrb[29].mxu1 }
 0x240   :  { %v817_v46 = vadd.f32 %v1421_v50, %v664_v45 }
 0x241   :  { %850 = vst [vmem:[#allocation9 + $0xe8] sm:$0xff] %v818_v44 }
 0x242   :  { %849 = vst [vmem:[#allocation9 + $0xe0] sm:$0xff] %v817_v46  ;;  %v1128_v47 = vpop.f32.mrb[30].mxu1 }
 0x243   :  { %v820_v48 = vadd.f32 %v1128_v47, %v1421_v50  ;;  %v674_v49 = vpop.f32.mrb[31].mxu1 }
 0x244   :  { %v819_v51 = vadd.f32 %v1421_v50, %v674_v49 }
 0x245   :  { %852 = vst [vmem:[#allocation9 + $0xf8] sm:$0xff] %v820_v48 }
 0x246   :  { %851 = vst [vmem:[#allocation9 + $0xf0] sm:$0xff] %v819_v51 }
 0x247   :  { %1276 = shalt.err (!%p1273_p0)
}
 0x248   :  { %s1277_s12 = scalar_lea.hbm %s1475_s5, 4096 }
 0x249   :  { %p1278_p1 = scmp.ne.s32.totalorder %s1475_s5, %s1277_s12  ;;  %p1281_p2 = scmp.lt.u32.totalorder %s1277_s12, %s1475_s5 }
 0x24b   :  { %p1283_p3 = pnand %p1281_p2, %p1278_p1 }
 0x24d   :  { %1286 = shalt.err (!%p1283_p3)
}
 0x24e   :  { %864 = dma.vmem_to_hbm [thread:$0]  %s859_s8, 4096, %s1475_s5, [#allocation5], %s1295_s30, %s1295_s30, %s1296_s6  }
 0x24f   :  { %1291 = dma.done.wait [#allocation5], 4096  }
 0x250   :  { %1292 = vsyncadd [#allocation5], 4294963200 }
 0x251   :  { %868 = vsyncpa [#allocation4], 1 }
 0x252   :  { %869 = vsyncpa [#allocation7], 1 }
 0x253   :  { %870 = vsyncpa [#allocation5], 1 }

</bundles_post_ra>
